<compile_context>
chip_gen: v7x
topology: tpu7x:2x2x1
jax: 0.10.0
libtpu: 0.0.40
codegen_flags: <defaults>
</compile_context>

<pallas_src>
import numpy as np
import jax
import jax.numpy as jnp
from jax.experimental import pallas as pl
from jax.experimental.pallas import tpu as pltpu


def _round_up(x, m):
    return ((x + m - 1) // m) * m


def _vmem_capacity_bytes():
    try:
        return int(pltpu.get_tpu_info().vmem_capacity_bytes)
    except Exception:
        return 64 * 1024 * 1024          # conservative (v7x-sized) fallback


def _step_working_set_bytes(tm, h_pad, c_pad, logits_bytes):
    # Double-buffered pipeline inputs/outputs + the in-kernel f32 temporaries.
    return (2 * tm * h_pad * 2               # x tile (bf16), 2 buffers
            + 2 * h_pad * c_pad * 2          # W (bf16), 2 buffers
            + 2 * c_pad * 4                  # bias (f32), 2 buffers
            + 2 * tm * 4                     # targets (i32), 2 buffers
            + 2 * tm * c_pad * logits_bytes  # logits tile, 2 buffers
            + 2 * tm * 4                     # loss tile (f32), 2 buffers
            + 3 * tm * c_pad * 4)            # f32 temps: logits, exp, one-hot select


def _pick_row_tile(h_pad, c_pad, logits_bytes):
    budget = int(0.6 * _vmem_capacity_bytes())
    for cand in (512, 256, 128, 64, 32, 16, 8):
        if _step_working_set_bytes(cand, h_pad, c_pad, logits_bytes) <= budget:
            return cand
    return 8


def _fused_heads_ce_kernel(x_ref, w_ref, b_ref, tgt_ref, logits_ref, loss_ref):
    # x_ref:      (TM, H_pad)       bf16   rows = flattened (B*S) tile
    # w_ref:      (1, H_pad, C_pad) bf16   one head's weights (resident per head)
    # b_ref:      (1, 1, C_pad)     f32    padded class lanes carry -1e30
    # tgt_ref:    (1, TM, 1)        int32
    # logits_ref: (1, TM, C_pad)    bf16
    # loss_ref:   (1, TM, 1)        f32    per-row cross-entropy
    x = x_ref[...]                                                   # (TM, H_pad)
    w = w_ref[0]                                                     # (H_pad, C_pad)
    # Padded class lanes are killed by the -1e30 bias: no in-kernel masking.
    logits = jnp.dot(x, w, preferred_element_type=jnp.float32) + b_ref[0]
    logits_ref[0] = logits.astype(logits_ref.dtype)                  # bf16 writeback

    # Numerically stable log-sum-exp over the class (lane) dim, in f32.
    m = jnp.max(logits, axis=-1, keepdims=True)                      # (TM, 1)
    lse = m + jnp.log(jnp.sum(jnp.exp(logits - m), axis=-1, keepdims=True))

    # Gather the target-class logit via a one-hot select (no dynamic lane gather).
    col = jax.lax.broadcasted_iota(jnp.int32, logits.shape, 1)
    tgt = tgt_ref[0]                                                 # (TM, 1)
    tgt_logit = jnp.sum(jnp.where(col == tgt, logits, 0.0),
                        axis=-1, keepdims=True)                      # (TM, 1)

    loss_ref[0] = lse - tgt_logit                                    # (TM, 1)


def _fused_heads_ce(inputs, targets, weights, biases, *, row_tile=None,
                    logits_dtype=jnp.bfloat16):
    """inputs: (B, S, H) float; targets: (K, B, S) int; weights: (K, H, C);
       biases: (K, C).  Returns (logits (K, B, S, C) in `logits_dtype`,
       per-position loss (K, B, S) f32)."""
    B, S, H = inputs.shape
    K, _, C = weights.shape
    N = B * S

    # Lane-aligned padding (H, C -> multiples of 128); row tiles multiple of 8.
    h_pad = _round_up(H, 128)
    c_pad = _round_up(C, 128)
    logits_bytes = jnp.dtype(logits_dtype).itemsize

    if row_tile is None:
        row_tile = _pick_row_tile(h_pad, c_pad, logits_bytes)
    tm = max(8, _round_up(min(row_tile, _round_up(N, 8)), 8))
    n_pad = _round_up(N, tm)
    n_tiles = n_pad // tm

    # Flatten (B, S) into rows -- a pure reshape, no HBM transpose.
    # (These pads/casts could be hoisted out of the hot path if W/b/targets are
    # reused across calls.)
    x2d = inputs.reshape(N, H).astype(jnp.bfloat16)
    x2d = jnp.pad(x2d, ((0, n_pad - N), (0, h_pad - H)))
    w = jnp.pad(weights.astype(jnp.bfloat16),
                ((0, 0), (0, h_pad - H), (0, c_pad - C)))
    # Padded class lanes get a -1e30 bias so the softmax ignores them without
    # any in-kernel masking; those lanes are sliced off before returning.
    b = jnp.pad(biases.astype(jnp.float32), ((0, 0), (0, c_pad - C)),
                constant_values=-1e30).reshape(K, 1, c_pad)
    tgt = jnp.pad(targets.astype(jnp.int32).reshape(K, N),
                  ((0, 0), (0, n_pad - N))).reshape(K, n_pad, 1)

    vmem_limit = int(min(int(0.85 * _vmem_capacity_bytes()),
                         max(32 * 1024 * 1024,
                             2 * _step_working_set_bytes(
                                 tm, h_pad, c_pad, logits_bytes))))

    logits, loss = pl.pallas_call(
        _fused_heads_ce_kernel,
        out_shape=(
            jax.ShapeDtypeStruct((K, n_pad, c_pad), logits_dtype),
            jax.ShapeDtypeStruct((K, n_pad, 1), jnp.float32),
        ),
        grid_spec=pltpu.PrefetchScalarGridSpec(
            num_scalar_prefetch=0,
            # Head axis outer so each head's W stays resident across all row
            # tiles; both axes are embarrassingly parallel (megacore / v7x).
            grid=(K, n_tiles),
            in_specs=[
                pl.BlockSpec((tm, h_pad), lambda k, r: (r, 0)),
                pl.BlockSpec((1, h_pad, c_pad), lambda k, r: (k, 0, 0)),
                pl.BlockSpec((1, 1, c_pad), lambda k, r: (k, 0, 0)),
                pl.BlockSpec((1, tm, 1), lambda k, r: (k, r, 0)),
            ],
            out_specs=[
                pl.BlockSpec((1, tm, c_pad), lambda k, r: (k, r, 0)),
                pl.BlockSpec((1, tm, 1), lambda k, r: (k, r, 0)),
            ],
        ),
        compiler_params=pltpu.CompilerParams(
            dimension_semantics=("parallel", "parallel"),
            vmem_limit_bytes=vmem_limit,
        ),
    )(x2d, w, b, tgt)

    logits = logits[:, :N, :C].reshape(K, B, S, C)
    loss_pos = loss[:, :N, 0].reshape(K, B, S)
    return logits, loss_pos


def compute_loss_cp2k_forward(inputs, targets, masks, weights, biases,
                              *, row_tile=None, logits_dtype=jnp.bfloat16):
    """Mirrors compute_loss_cp2k.forward(model, inputs, targets, masks).

    # TODO(synk): the actual `model` architecture is not given in the spec;
    # it is instantiated here as K independent linear classification heads
    # (inputs @ W_k + b_k); `masks` is only consumed by the loss selection.
    Returns (loss, pred_targets): loss is the elementwise sum over heads of
    the per-unmasked-position cross-entropy (shape (n_valid,)); pred_targets
    is a tuple of K (B, S, C) logit arrays (bfloat16 by default).
    """
    logits, loss_pos = _fused_heads_ce(inputs, targets, weights, biases,
                                       row_tile=row_tile,
                                       logits_dtype=logits_dtype)
    total_pos = jnp.sum(loss_pos, axis=0)                  # (B, S): sum(loss)
    # TODO(synk): PyTorch's ragged `pred[~masks.T]` selection has a
    # data-dependent output shape; it is done on the host with concrete mask
    # values (non-jittable with traced masks).
    valid = ~np.asarray(masks).T                           # (B, S)
    idx = np.nonzero(valid.reshape(-1))[0]
    loss = total_pos.reshape(-1)[jnp.asarray(idx)]
    pred_targets = tuple(logits[k] for k in range(logits.shape[0]))
    return loss, pred_targets


def _reference(inputs, targets, masks, weights, biases):
    # Plain-JAX reference of the PyTorch forward (same bf16 rounding of the
    # matmul operands as the kernel, f32 accumulation).
    x = inputs.astype(jnp.bfloat16).astype(jnp.float32)
    w = weights.astype(jnp.bfloat16).astype(jnp.float32)
    logits = jnp.einsum('bsh,khc->kbsc', x, w,
                        precision=jax.lax.Precision.HIGHEST)
    logits = logits + biases[:, None, None, :]             # (K, B, S, C)
    m = jnp.max(logits, axis=-1, keepdims=True)
    lse = (m + jnp.log(jnp.sum(jnp.exp(logits - m), axis=-1, keepdims=True)))[..., 0]
    tgt_logit = jnp.take_along_axis(
        logits, targets[..., None].astype(jnp.int32), axis=-1)[..., 0]
    loss_pos = lse - tgt_logit                              # (K, B, S)
    total = jnp.sum(loss_pos, axis=0)                       # (B, S)
    valid = ~np.asarray(masks).T
    idx = np.nonzero(valid.reshape(-1))[0]
    preds = tuple(logits[k] for k in range(logits.shape[0]))
    return total.reshape(-1)[jnp.asarray(idx)], preds


if __name__ == "__main__":
    K, B, S, H, C = 2, 2, 24, 32, 16

    key = jax.random.PRNGKey(0)
    k_in, k_w, k_b, k_t, k_m = jax.random.split(key, 5)
    inputs = jax.random.normal(k_in, (B, S, H), dtype=jnp.float32)
    weights = 0.1 * jax.random.normal(k_w, (K, H, C), dtype=jnp.float32)
    biases = 0.1 * jax.random.normal(k_b, (K, C), dtype=jnp.float32)
    targets = jax.random.randint(k_t, (K, B, S), 0, C, dtype=jnp.int32)
    masks = jax.random.bernoulli(k_m, 0.25, (S, B))
    masks = masks.at[0, 0].set(False)      # guarantee at least one valid position

    # row_tile=16 only to exercise multi-tile grids at toy sizes; the default
    # (row_tile=None) picks up to 512-row tiles from the VMEM budget.
    loss, pred_targets = compute_loss_cp2k_forward(
        inputs, targets, masks, weights, biases, row_tile=16)
    jax.block_until_ready((loss, pred_targets))

    ref_loss, ref_preds = _reference(inputs, targets, masks, weights, biases)

    assert len(pred_targets) == K
    assert all(p.shape == (B, S, C) for p in pred_targets)
    assert loss.shape == ref_loss.shape
    # Loss is computed from the f32 accumulator inside the kernel -> tight.
    assert jnp.allclose(loss, ref_loss, atol=1e-3, rtol=1e-3)
    # pred_targets are written back in bf16 -> compare with bf16 tolerance.
    for k in range(K):
        assert jnp.allclose(pred_targets[k].astype(jnp.float32), ref_preds[k],
                            atol=3e-2, rtol=3e-2)

    print("KERNEL_OK")
</pallas_src>

<mosaic_0001>
module attributes {stable_mosaic.version = 11 : i64} {
  func.func @_fused_heads_ce_kernel(%arg0: i32, %arg1: i32, %arg2: memref<16x128xbf16, #tpu.memory_space<vmem>>, %arg3: memref<1x128x128xbf16, #tpu.memory_space<vmem>>, %arg4: memref<1x1x128xf32, #tpu.memory_space<vmem>>, %arg5: memref<1x16x1xi32, #tpu.memory_space<vmem>>, %arg6: memref<1x16x128xbf16, #tpu.memory_space<vmem>>, %arg7: memref<1x16x1xf32, #tpu.memory_space<vmem>>) attributes {dimension_semantics = [#tpu.dimension_semantics<parallel>, #tpu.dimension_semantics<parallel>], iteration_bounds = array<i64: 2, 3>, scalar_prefetch = 0 : i64, scratch_operands = 0 : i64, tpu.core_type = #tpu.core_type<tc>, window_params = [{transform_indices = @transform_0, window_bounds = array<i64: 16, 128>}, {transform_indices = @transform_1, window_bounds = array<i64: 1, 128, 128>}, {transform_indices = @transform_2, window_bounds = array<i64: 1, 1, 128>}, {transform_indices = @transform_3, window_bounds = array<i64: 1, 16, 1>}, {transform_indices = @transform_4, window_bounds = array<i64: 1, 16, 128>}, {transform_indices = @transform_5, window_bounds = array<i64: 1, 16, 1>}]} {
    %c0 = arith.constant 0 : index
    %c0_0 = arith.constant 0 : index
    %0 = vector.load %arg2[%c0, %c0_0] : memref<16x128xbf16, #tpu.memory_space<vmem>>, vector<16x128xbf16>
    %c0_1 = arith.constant 0 : index
    %c0_2 = arith.constant 0 : index
    %c0_3 = arith.constant 0 : index
    %1 = vector.load %arg3[%c0_1, %c0_2, %c0_3] : memref<1x128x128xbf16, #tpu.memory_space<vmem>>, vector<1x128x128xbf16>
    %2 = vector.shape_cast %1 : vector<1x128x128xbf16> to vector<128x128xbf16>
    %cst = arith.constant dense<0.000000e+00> : vector<16x128xf32>
    %3 = tpu.matmul %0, %2, %cst {dimension_numbers = #tpu.dot_dimension_numbers<[1], [0], [0], [1], [0, 0, 1, 1], [], []>} : vector<16x128xbf16>, vector<128x128xbf16>, vector<16x128xf32> -> vector<16x128xf32>
    %c0_4 = arith.constant 0 : index
    %c0_5 = arith.constant 0 : index
    %c0_6 = arith.constant 0 : index
    %4 = vector.load %arg4[%c0_4, %c0_5, %c0_6] : memref<1x1x128xf32, #tpu.memory_space<vmem>>, vector<1x1x128xf32>
    %5 = vector.shape_cast %4 : vector<1x1x128xf32> to vector<1x128xf32>
    %6 = vector.broadcast %5 : vector<1x128xf32> to vector<16x128xf32>
    %7 = arith.addf %3, %6 : vector<16x128xf32>
    %8 = arith.truncf %7 : vector<16x128xf32> to vector<16x128xbf16>
    %c0_7 = arith.constant 0 : index
    %c0_8 = arith.constant 0 : index
    %c0_9 = arith.constant 0 : index
    %9 = vector.load %arg6[%c0_7, %c0_8, %c0_9] : memref<1x16x128xbf16, #tpu.memory_space<vmem>>, vector<1x16x128xbf16>
    %10 = vector.shape_cast %9 : vector<1x16x128xbf16> to vector<16x128xbf16>
    %11 = vector.shape_cast %8 : vector<16x128xbf16> to vector<1x16x128xbf16>
    tpu.vector_store %arg6[%c0_7, %c0_8, %c0_9], %11 {strides = array<i32>} : memref<1x16x128xbf16, #tpu.memory_space<vmem>>, vector<1x16x128xbf16>,
    %cst_10 = arith.constant dense<0xFF800000> : vector<16xf32>
    %12 = vector.multi_reduction <maximumf>, %7, %cst_10 [1] : vector<16x128xf32> to vector<16xf32>
    %13 = vector.shape_cast %12 : vector<16xf32> to vector<16x1xf32>
    %14 = vector.broadcast %13 : vector<16x1xf32> to vector<16x128xf32>
    %15 = arith.subf %7, %14 : vector<16x128xf32>
    %16 = math.exp %15 : vector<16x128xf32>
    %cst_11 = arith.constant dense<0.000000e+00> : vector<16xf32>
    %17 = vector.multi_reduction <add>, %16, %cst_11 [1] : vector<16x128xf32> to vector<16xf32>
    %18 = vector.shape_cast %17 : vector<16xf32> to vector<16x1xf32>
    %19 = math.log %18 : vector<16x1xf32>
    %20 = arith.addf %13, %19 : vector<16x1xf32>
    %21 = tpu.iota {dimensions = array<i32: 1>} : vector<16x128xi32>
    %c0_12 = arith.constant 0 : index
    %c0_13 = arith.constant 0 : index
    %c0_14 = arith.constant 0 : index
    %22 = vector.load %arg5[%c0_12, %c0_13, %c0_14] : memref<1x16x1xi32, #tpu.memory_space<vmem>>, vector<1x16x1xi32>
    %23 = vector.shape_cast %22 : vector<1x16x1xi32> to vector<16x1xi32>
    %24 = vector.broadcast %23 : vector<16x1xi32> to vector<16x128xi32>
    %25 = arith.cmpi eq, %21, %24 : vector<16x128xi32>
    %cst_15 = arith.constant 0.000000e+00 : f32
    %26 = vector.broadcast %cst_15 : f32 to vector<16x128xf32>
    %27 = arith.select %25, %7, %26 : vector<16x128xi1>, vector<16x128xf32>
    %cst_16 = arith.constant dense<0.000000e+00> : vector<16xf32>
    %28 = vector.multi_reduction <add>, %27, %cst_16 [1] : vector<16x128xf32> to vector<16xf32>
    %29 = vector.shape_cast %28 : vector<16xf32> to vector<16x1xf32>
    %30 = arith.subf %20, %29 : vector<16x1xf32>
    %c0_17 = arith.constant 0 : index
    %c0_18 = arith.constant 0 : index
    %c0_19 = arith.constant 0 : index
    %31 = vector.load %arg7[%c0_17, %c0_18, %c0_19] : memref<1x16x1xf32, #tpu.memory_space<vmem>>, vector<1x16x1xf32>
    %32 = vector.shape_cast %31 : vector<1x16x1xf32> to vector<16x1xf32>
    %33 = vector.shape_cast %30 : vector<16x1xf32> to vector<1x16x1xf32>
    tpu.vector_store %arg7[%c0_17, %c0_18, %c0_19], %33 {strides = array<i32>} : memref<1x16x1xf32, #tpu.memory_space<vmem>>, vector<1x16x1xf32>,
    return
  }
  func.func @transform_0(%arg0: i32, %arg1: i32) -> (i32, i32) {
    %c0_i32 = arith.constant 0 : i32
    %c0_i32_0 = arith.constant 0 : i32
    return %arg1, %c0_i32 : i32, i32
  }
  func.func @transform_1(%arg0: i32, %arg1: i32) -> (i32, i32, i32) {
    %c0_i32 = arith.constant 0 : i32
    %c0_i32_0 = arith.constant 0 : i32
    %c0_i32_1 = arith.constant 0 : i32
    return %arg0, %c0_i32, %c0_i32_0 : i32, i32, i32
  }
  func.func @transform_2(%arg0: i32, %arg1: i32) -> (i32, i32, i32) {
    %c0_i32 = arith.constant 0 : i32
    %c0_i32_0 = arith.constant 0 : i32
    %c0_i32_1 = arith.constant 0 : i32
    return %arg0, %c0_i32, %c0_i32_0 : i32, i32, i32
  }
  func.func @transform_3(%arg0: i32, %arg1: i32) -> (i32, i32, i32) {
    %c0_i32 = arith.constant 0 : i32
    %c0_i32_0 = arith.constant 0 : i32
    return %arg0, %arg1, %c0_i32 : i32, i32, i32
  }
  func.func @transform_4(%arg0: i32, %arg1: i32) -> (i32, i32, i32) {
    %c0_i32 = arith.constant 0 : i32
    %c0_i32_0 = arith.constant 0 : i32
    return %arg0, %arg1, %c0_i32 : i32, i32, i32
  }
  func.func @transform_5(%arg0: i32, %arg1: i32) -> (i32, i32, i32) {
    %c0_i32 = arith.constant 0 : i32
    %c0_i32_0 = arith.constant 0 : i32
    return %arg0, %arg1, %c0_i32 : i32, i32, i32
  }
}

</mosaic_0001>

<bundles_post_ra>
// kernel: tpu_custom_call.1
= control target key start
LH: loop header
LB: loop body
LE: loop exit
PB: predicated region body
PF: predicated region fallthrough
CT: control target
= control target key end

     0   :  { %11 = vsyncpa [#allocation3], 0  ;;  %s1390_s0 = inlined_call_operand.vmem [shape: bf16[48,128], index: 0, kind: input, shape index: {}]   ;;  %s1391_s1 = inlined_call_operand.hbm [shape: bf16[2,128,128], index: 1, kind: input, shape index: {}]   ;;  %s1392_s2 = inlined_call_operand.vmem [shape: f32[2,1,128], index: 2, kind: input, shape index: {}]   ;;  %s1393_s3 = inlined_call_operand.vmem [shape: s32[2,48,1], index: 3, kind: input, shape index: {}]   ;;  %s1394_s4 = inlined_call_operand.hbm [shape: bf16[2,48,128], index: 4, kind: output, shape index: {0}]   ;;  %s1395_s5 = inlined_call_operand.vmem [shape: f32[2,48,1], index: 5, kind: output, shape index: {1}]  }
   0x1   :  { %13 = vsyncpa [#allocation3 + $0x1], 0 }
   0x2   :  { %14 = vsyncpa [#allocation4], 0 }
   0x3   :  { %16 = vsyncpa [#allocation4 + $0x1], 0  ;;  %s1113_s18 = smov 0   ;;  %s1115_s19 = smov 0  }
   0x4   :  { %s1117_s20 = smov 0   ;;  %s1119_s21 = smov 0  }
   0x5   :  { %s1121_s22 = smov 0   ;;  %s1123_s23 = smov 0  }
   0x6   :  { %s1125_s24 = smov 0   ;;  %s1127_s25 = smov 0  }
   0x7   :  { %s1129_s26 = smov 0   ;;  %s1131_s27 = smov 0  }
   0x8   :  { %s1133_s28 = smov 0  }
   0x9 LB: > { %1401 = sst [smem:[#allocation8_spill]] %s1068_s27  ;;  %s720_s29 = sadd.s32 4294967295, %s1072_s28   ;;  %s1072_s28 = sphi %s1133_s28, %s22_s28   ;;  %s1068_s27 = sphi %s1131_s27, %s1415_s27   ;;  %s1064_s26 = sphi %s1129_s26, %s1423_s26   ;;  %s1060_s25 = sphi %s1127_s25, %s1413_s25   ;;  %s1056_s24 = sphi %s1125_s24, %s1422_s24   ;;  %s1052_s23 = sphi %s1123_s23, %s1421_s23   ;;  %s1048_s22 = sphi %s1121_s22, %s1420_s22   ;;  %s1044_s21 = sphi %s1119_s21, %s1419_s21   ;;  %s1040_s20 = sphi %s1117_s20, %s1418_s20   ;;  %s1036_s19 = sphi %s1115_s19, %s1417_s19   ;;  %s1032_s18 = sphi %s1113_s18, %s1416_s18  }
   0xa   : > { %s721_s30 = sadd.s32 4294967294, %s1072_s28   ;;  %s31_s6 = sadd.s32 1, %s1064_s26 }
   0xb   : > { %s34_s7 = sadd.s32 1, %s1068_s27  ;;  %p32_p0 = scmp.ge.s32.totalorder %s31_s6, 3 }
   0xc   : > { %s67_s8 = sadd.s32 1, %s1052_s23  ;;  %p74_p1 = scmp.ne.s32.totalorder %s1052_s23, %s1048_s22 }
   0xd   : > { %p75_p2 = scmp.eq.s32.totalorder %s1072_s28, 0  ;;  %s1425_s6 = smov (%p32_p0, %s31_s6), 0 }
   0xe   : > { %1402 = sst [smem:[#allocation9_spill]] %s1425_s6  ;;  %s1427_s7 = smov (!%p32_p0, %s34_s7), %s1068_s27 }
   0xf   : > { %p1177_p3 = por %p75_p2, %p74_p1  ;;  %p80_p4 = scmp.ne.s32.totalorder %s1048_s22, %s1044_s21 }
  0x10   : > { %p36_p5 = scmp.ge.s32.totalorder %s1427_s7, 2  ;;  %p81_p6 = scmp.eq.s32.totalorder %s720_s29, 0 }
  0x11   : > { %s145_s10 = ssub.s32 %s1064_s26, %s1425_s6  ;;  %s149_s11 = sadd.s32 1, %s1040_s20 }
  0x12   : > { %s1429_s7 = smov (%p36_p5, %s1427_s7), 0  ;;  %p1187_p7 = por %p81_p6, %p80_p4 }
  0x13   : > { %1404 = sst [smem:[#allocation10_spill]] %s1429_s7  ;;  %p159_p8 = scmp.ne.s32.totalorder %s1040_s20, %s1036_s19 }
  0x14   : > { %s64_s13 = ssub.s32 %s1068_s27, %s1429_s7  ;;  %p160_p9 = scmp.eq.s32.totalorder %s720_s29, 5 }
  0x15   : > { %p65_p10 = scmp.eq.s32.totalorder %s64_s13, 0  ;;  %s146_s14 = sor.u32 %s145_s10, %s64_s13 }
  0x16   : > { %p147_p11 = scmp.eq.s32.totalorder %s146_s14, 0  ;;  %p1195_p12 = por %p160_p9, %p159_p8 }
  0x17   : > { %s1200_s16 = scalar_select %p65_p10, %s1052_s23, %s67_s8  }
  0x18   : > { %s1406_s15 = scalar_select %p1195_p12, 1, 0 }
  0x19   : > { %s1203_s17 = scalar_select %p147_p11, %s1040_s20, %s149_s11  }
  0x1a   : > { %p165_p13 = scmp.ne.s32.totalorder %s1036_s19, %s1032_s18  ;;  %p166_p0 = scmp.eq.s32.totalorder %s721_s30, 5 }
  0x1b   : > { %p804_p1 = scmp.lt.s32.totalorder %s1072_s28, 6  ;;  %s223_s29 = sand.u32 1, %s1052_s23  }
  0x1c   : > { %p1208_p2 = por %p166_p0, %p165_p13  ;;  %s724_s10 = sshll.u32 %s223_s29, 6 }
  0x1d   : > { %s753_s13 = sshll.u32 %s1068_s27, 10  ;;  %s227_s8 = scalar_lea.vmem [#allocation2], %s724_s10 }
  0x1e   : > { %s1407_s21 = scalar_select %p1208_p2, 1, 0 }
  0x1f   : > { %s1217_s6 = scalar_lea.hbm %s1391_s1, %s753_s13  ;;  %s234_s11 = sshll.u32 %s227_s8, 4  ;;  %s1219_s11 = int_to_ptr.vmem [resolvable:$true] %s234_s11 }
  0x20   : > { %p1223_p4 = pnand %p804_p1, %p1177_p3  ;;  %s1228_s27 = scalar_lea.sflag [#allocation3], %s223_s29 }
  0x21   : > { %s920_s7 = scalar_lea.hbm %s1217_s6, 1024  ;;  %s925_s9 = scalar_lea.hbm %s1391_s1, 2048 }
  0x22   : > { %p921_p6 = scmp.ne.s32.totalorder %s1217_s6, %s920_s7  ;;  %p922_p8 = pneg %p1223_p4 }
  0x23   : > { %p926_p3 = scmp.lt.u32.totalorder %s1217_s6, %s1391_s1  ;;  %p927_p11 = scmp.lt.u32.totalorder %s925_s9, %s920_s7 }
  0x24   : > { %p923_p9 = pnand %p922_p8, %p921_p6  ;;  %p929_p0 = scmp.lt.u32.totalorder %s920_s7, %s1217_s6 }
  0x25   : > { %p928_p13 = por %p927_p11, %p926_p3 }
  0x26   : > { %p924_p10 = pneg %p923_p9 }
  0x27   : > { %p930_p1 = por %p929_p0, %p928_p13 }
  0x29   : > { %p931_p5 = pnand %p930_p1, %p924_p10 }
  0x2b   : > { %934 = shalt.err (!%p931_p5)
}
  0x2c   : > { %s935_s29 = scalar_lea.vmem %s1219_s11, 1024  ;;  %s1074_s10 = smov [#allocation2]  }
  0x2d   : > { %p936_p6 = scmp.ne.s32.totalorder %s1219_s11, %s935_s29  ;;  %s940_s13 = sshll.u32 %s1074_s10, 4  ;;  %s941_s13 = int_to_ptr.vmem [resolvable:$false] %s940_s13 }
  0x2e   : > { %s942_s14 = scalar_lea.vmem %s941_s13, 2048  ;;  %p943_p12 = scmp.lt.s32.totalorder %s1219_s11, %s941_s13 }
  0x2f   : > { %p938_p9 = pnand %p936_p6, %p922_p8  ;;  %p944_p3 = scmp.lt.s32.totalorder %s942_s14, %s935_s29 }
  0x31   : > { %p939_p2 = pneg %p938_p9  ;;  %p945_p11 = por %p944_p3, %p943_p12 }
  0x33   : > { %p946_p13 = pnand %p945_p11, %p939_p2 }
  0x35   : > { %949 = shalt.err (!%p946_p13)
}
  0x36   : > { %s1075_s7 = smov 64   ;;  %s1076_s9 = smov 4  }
  0x37   : > { %799 = dma.hbm_to_vmem [thread:$0]  (!%p1223_p4), %s1217_s6, 1024, %s1219_s11, %s1228_s27, %s1075_s7, %s1075_s7, %s1076_s9  }
  0x38   : > { %p261_p5 = scmp.lt.s32.totalorder %s1072_s28, 7  ;;  %p1409_p8 = scmp.ge.s32.totalorder %s1072_s28, 1 }
  0x3a   : > { %p262_p10 = pnand %p1409_p8, %p261_p5 }
  0x3b   : > { %s267_s8 = sand.u32 (!%p262_p10), 1, %s1048_s22  }
  0x3c   : > { %265 = sbr.rel (%p262_p10) target bundleno = 637 (0x27d), region = 36  ;;  %s728_s29 = sshll.u32 (!%p262_p10), %s267_s8, 6 }
  0x3d   : > { %s268_s10 = scalar_lea.sflag (!%p262_p10), [#allocation3], %s267_s8  ;;  %s1260_s13 = scalar_lea.vmem (!%p262_p10), [#allocation2], %s728_s29 }
  0x43   : > { %1023 = dma.done.wait (%p1187_p7), %s268_s10, 1024  }
  0x44   : > { %1025 = vsyncadd (%p1187_p7), %s268_s10, 4294966272  ;;  %s1267_s27 = sshll.u32 %s1056_s24, 1  ;;  %p330_p12 = scmp.lt.s32.totalorder %s1060_s25, 1  ;;  %v1077_v0 = vmov 0.0   ;;  %vm1078_vm0 = vmmov 0   ;;  %v1079_v1 = vmov 0   ;;  %v505_v27 = vlaneseq }
  0x45   : > { %770 = vmatprep.subr.bf16.mxu0 %v1077_v0  ;;  %786 = vmatprep.mubr.msk.bf16.mxu0 %vm1078_vm0, %v1077_v0  ;;  %p325_p2 = scmp.lt.s32.totalorder %s1267_s27, 5  ;;  %v903_v2 = vld [vmem:[%s1260_s13] sm:$0xff]   ;;  %v904_v3 = vld [vmem:[%s1260_s13 + $0x8] sm:$0xff]   ;;  %v905_v4 = vld [vmem:[%s1260_s13 + $0x10] sm:$0xff]   ;;  %s310_s9 = sand.u32 1, %s1036_s19  }
  0x46   : > { %901 = vset.pattern.permute.xlu1 %v1079_v1  ;;  %s1272_s6 = scalar_select %p330_p12, %s1060_s25, 1  ;;  %902 = vset.pattern.permute.xlu0 %v1079_v1  ;;  %v906_v6 = vld [vmem:[%s1260_s13 + $0x18] sm:$0xff]   ;;  %v907_v8 = vld [vmem:[%s1260_s13 + $0x20] sm:$0xff]   ;;  %v908_v9 = vld [vmem:[%s1260_s13 + $0x28] sm:$0xff]   ;;  %v506_v29 = vand.u32 127, %v505_v27 }
  0x47   : > { %s326_s24 = scalar_select %p325_p2, %s1267_s27, 5  ;;  %771 = vmatpush3.bf16.msra.mxu0 %v903_v2  ;;  %v909_v10 = vld [vmem:[%s1260_s13 + $0x30] sm:$0xff]   ;;  %v910_v11 = vld [vmem:[%s1260_s13 + $0x38] sm:$0xff]  }
  0x48   : > { %s790_s12 = smul.u32 6, %s1272_s6  ;;  %772 = vmatprep.subr.bf16.mxu0 %v1077_v0  ;;  %s332_s7 = scalar_lea.vmem %s1392_s2, %s1272_s6 }
  0x49   : > { %s731_s14 = sshll.u32 %s326_s24, 2  ;;  %v736_v13 = vld [vmem:[%s332_s7] ss:$0 sm:$0xff]  ;;  %s791_s6 = smul.u32 6, %s1060_s25 }
  0x4a   : > { %s1277_s11 = sadd.s32 %s790_s12, %s326_s24  ;;  %s328_s12 = scalar_lea.vmem %s1390_s0, %s731_s14 }
  0x4b   : > { %s1400_s30 = sshll.u32 %s1277_s11, 3  ;;  %773 = vmatpush3.bf16.msra.mxu0 %v904_v3  ;;  %v911_v12 = vld [vmem:[%s328_s12] sm:$0xff]   ;;  %s550_s29 = sadd.s32 %s791_s6, %s1267_s27 }
  0x4c   : > { %s341_s8 = scalar_lea.vmem %s1393_s3, %s1400_s30  ;;  %774 = vmatprep.subr.bf16.mxu0 %v1077_v0  ;;  %s750_s10 = sshll.u32 %s550_s29, 6 }
  0x4d   : > { %v507_v5 = vld [vmem:[%s341_s8] sm:$0xff]  ;;  %v508_v7 = vld [vmem:[%s341_s8 + $0x8] sm:$0xff]  ;;  %s1302_s8 = sshll.u32 %s310_s9, 3  ;;  %s1316_s7 = scalar_lea.hbm %s1394_s4, %s750_s10 }
  0x4e   : > { %510 = vperm.xlu1 %901, %v507_v5   ;;  %s312_s13 = scalar_lea.vmem [#allocation5], %s1302_s8  ;;  %s1322_s8 = scalar_lea.sflag [#allocation4], %s310_s9 }
  0x4f   : > { %775 = vmatpush3.bf16.msra.mxu0 %v905_v4  ;;  %s553_s12 = sshll.u32 %s312_s13, 4  ;;  %p1410_p4 = scmp.ne.s32.totalorder %s1406_s15, 0  ;;  %s1318_s12 = int_to_ptr.vmem [resolvable:$true] %s553_s12 }
  0x50   : > { %776 = vmatprep.subr.bf16.mxu0 %v1077_v0  ;;  %s950_s30 = scalar_lea.vmem %s1318_s12, 128  ;;  %s1080_s25 = smov [#allocation5]  }
  0x51   : > { %p951_p7 = scmp.ne.s32.totalorder %s1318_s12, %s950_s30  ;;  %s954_s27 = sshll.u32 %s1080_s25, 4  ;;  %s955_s27 = int_to_ptr.vmem [resolvable:$false] %s954_s27 }
  0x52   : > { %513 = vperm.xlu1 %901, %v508_v7   ;;  %p957_p6 = scmp.lt.s32.totalorder %s1318_s12, %s955_s27 }
  0x53   : > { %777 = vmatpush3.bf16.msra.mxu0 %v906_v6  ;;  %p952_p0 = pnand %p951_p7, %p1410_p4 }
  0x54   : > { %778 = vmatprep.subr.bf16.mxu0 %v1077_v0 }
  0x55   : > { %p953_p1 = pneg %p952_p0 }
  0x57   : > { %779 = vmatpush3.bf16.msra.mxu0 %v907_v8 }
  0x58   : > { %780 = vmatprep.subr.bf16.mxu0 %v1077_v0 }
  0x5b   : > { %781 = vmatpush3.bf16.msra.mxu0 %v908_v9 }
  0x5c   : > { %782 = vmatprep.subr.bf16.mxu0 %v1077_v0 }
  0x5f   : > { %783 = vmatpush3.bf16.msra.mxu0 %v909_v10 }
  0x60   : > { %784 = vmatprep.subr.bf16.mxu0 %v1077_v0 }
  0x63   : > { %785 = vmatpush3.bf16.msra.mxu0 %v910_v11 }
  0x66   : > { %787 = vmatmul.mubr.bf16.vlgmr.msra.gmra.mrb[0].mxu0 %v911_v12 }
  0xcd   : > { %v511_v28 = vpop.permute.xlu1 %510 }
  0xce   : > { %vm515_vm1 = vcmp.eq.s32.totalorder %v506_v29, %v511_v28 }
  0xd1   : > { %v514_v31 = vpop.permute.xlu1 %513 }
  0xd2   : > { %vm516_vm2 = vcmp.eq.s32.totalorder %v506_v29, %v514_v31 }
 0x139   : > { %v468_v14 = vpop.f32.mrb[0].mxu0 }
 0x13a   : > { %v469_v15 = vadd.f32 %v736_v13, %v468_v14  ;;  %v788_v16 = vpop.f32.mrb[1].mxu0 }
 0x13b   : > { %v471_v17 = vpop.f32.mrb[2].mxu0 }
 0x13c   : > { %v472_v18 = vadd.f32 %v736_v13, %v471_v17  ;;  %485 = vmax.xlane.f32.xlu0 %v469_v15  ;;  %v789_v19 = vpop.f32.mrb[3].mxu0  ;;  %v517_v33 = vsel %vm515_vm1, %v469_v15, 0.0 }
 0x13e   : > { %v759_v20 = vpack.c.bf16 %v472_v18, %v469_v15  ;;  %v518_v34 = vsel %vm516_vm2, %v472_v18, 0.0 }
 0x140   : > { %487 = vmax.xlane.f32.xlu0 %v472_v18  ;;  %760 = vst [vmem:[%s312_s13] sm:$0xff] %v759_v20   ;;  %s956_s13 = scalar_lea.vmem %s955_s27, 256 }
 0x141   : > { %p958_p9 = scmp.lt.s32.totalorder %s956_s13, %s950_s30 }
 0x143   : > { %p959_p3 = por %p958_p9, %p957_p6 }
 0x145   : > { %p960_p11 = pnand %p959_p3, %p953_p1 }
 0x1c9   : > { %v1305_v21 = vpop.xlane.xlu0 %485 }
 0x1ca   : > { %v489_v22 = vsub.f32 %v469_v15, %v1305_v21 }
 0x1cc   : > { %v491_v23 = vmul.f32 1.442695, %v489_v22 }
 0x1cd   : > { %v1308_v24 = vpop.xlane.xlu0 %487 }
 0x1ce   : > { %912 = vpow2.f32 %v491_v23  ;;  %v490_v25 = vsub.f32 %v472_v18, %v1308_v24 }
 0x1d0   : > { %v493_v26 = vmul.f32 1.442695, %v490_v25 }
 0x1d2   : > { %914 = vpow2.f32 %v493_v26 }
 0x1d8   : > { %v913_v30 = vpop.eup %912 }
 0x1d9   : > { %495 = vadd.xlane.f32.xlu0 %v913_v30 }
 0x1dc   : > { %v915_v32 = vpop.eup %914 }
 0x1dd   : > { %519 = vadd.xlane.f32.xlu0 %v517_v33  ;;  %497 = vadd.xlane.f32.xlu1 %v915_v32 }
 0x1e1   : > { %521 = vadd.xlane.f32.xlu0 %v518_v34 }
 0x1e2   : > { %963 = shalt.err (!%p960_p11)
}
 0x1e3   : > { %s964_s9 = scalar_lea.hbm %s1316_s7, 128  ;;  %s968_s10 = scalar_lea.hbm %s1394_s4, 768 }
 0x1e4   : > { %p965_p13 = scmp.ne.s32.totalorder %s1316_s7, %s964_s9  ;;  %p969_p10 = scmp.lt.u32.totalorder %s1316_s7, %s1394_s4 }
 0x1e5   : > { %p970_p12 = scmp.lt.u32.totalorder %s968_s10, %s964_s9  ;;  %p972_p7 = scmp.lt.u32.totalorder %s964_s9, %s1316_s7 }
 0x1e6   : > { %p966_p5 = pnand %p965_p13, %p1410_p4 }
 0x1e7   : > { %p971_p2 = por %p970_p12, %p969_p10 }
 0x1e8   : > { %p967_p8 = pneg %p966_p5 }
 0x1e9   : > { %p973_p0 = por %p972_p7, %p971_p2 }
 0x1eb   : > { %p974_p1 = pnand %p973_p0, %p967_p8 }
 0x1ed   : > { %977 = shalt.err (!%p974_p1)
}
 0x1ee   : > { %s1081_s30 = smov 64   ;;  %s1082_s25 = smov 4   ;;  %vm525_vm3 = vcmask 7168  }
 0x1ef   : > { %794 = dma.vmem_to_hbm [thread:$0]  (%p1410_p4), %s1318_s12, 128, %s1316_s7, %s1322_s8, %s1081_s30, %s1081_s30, %s1082_s25  }
 0x1f0   : > { %s1411_s27 = sshll.u32 %s1277_s11, 3 }
 0x1f1   : > { %s352_s6 = scalar_lea.vmem %s1395_s5, %s1411_s27 }
 0x266   : > { %v496_v35 = vpop.xlane.xlu0 %495 }
 0x267   : > { %916 = vlog2.f32 %v496_v35 }
 0x26a   : > { %v498_v36 = vpop.xlane.xlu1 %497  ;;  %v520_v39 = vpop.xlane.xlu0 %519 }
 0x26b   : > { %918 = vlog2.f32 %v498_v36 }
 0x26e   : > { %v522_v45 = vpop.xlane.xlu0 %521 }
 0x271   : > { %v917_v37 = vpop.eup %916 }
 0x272   : > { %v500_v38 = vmul.f32 0.6931472, %v917_v37 }
 0x274   : > { %v503_v40 = vadd.f32 %v500_v38, %v1305_v21 }
 0x275   : > { %v919_v41 = vpop.eup %918 }
 0x276   : > { %v502_v42 = vmul.f32 0.6931472, %v919_v41  ;;  %v523_v43 = vsub.f32 %v503_v40, %v520_v39 }
 0x278   : > { %526 = vst.msk [vmem:[%s352_s6] sm:$0xff] %vm525_vm3, %v523_v43  ;;  %v504_v44 = vadd.f32 %v502_v42, %v1308_v24 }
 0x27a   : > { %v524_v46 = vsub.f32 %v504_v44, %v522_v45 }
 0x27c   : > { %527 = vst.msk [vmem:[%s352_s6 + $0x8] sm:$0xff] %vm525_vm3, %v524_v46 }
 0x27d PF: > { %p805_p4 = scmp.ge.s32.totalorder %s1072_s28, 2  ;;  %s572_s15 = sand.u32 1, %s1032_s18  }
 0x27e   : > { %p1412_p6 = scmp.ne.s32.totalorder %s1407_s21, 0  ;;  %s573_s11 = scalar_lea.sflag [#allocation4], %s572_s15 }
 0x280   : > { %p801_p9 = pnand %p805_p4, %p1412_p6 }
 0x282   : > { %1027 = dma.done.wait (!%p801_p9), %s573_s11, 128  }
 0x283   : > { %1029 = vsyncadd (!%p801_p9), %s573_s11, 4294967168  ;;  %s22_s28 = sadd.s32 1, %s1072_s28   ;;  %s1413_s25 = sld [smem:[#allocation8_spill]] }
 0x284   : > { %p19_p3 = scmp.ge.s32.totalorder %s22_s28, 8   ;;  %s1414_s12 = sld [smem:[#allocation9_spill]] }
 0x285   : > { %s1415_s27 = sld [smem:[#allocation10_spill]]  ;;  %s1416_s18 = smov %s1036_s19 }
 0x286   : > { %s1417_s19 = smov %s1040_s20  ;;  %s1418_s20 = smov %s1203_s17 }
 0x287   : > { %s1419_s21 = smov %s1048_s22  ;;  %s1420_s22 = smov %s1052_s23 }
 0x288   : > { %s1421_s23 = smov %s1200_s16  ;;  %s1422_s24 = smov %s1064_s26 }
 0x289   :  { %21 = sbr.rel (!%p19_p3) target bundleno = 9 (0x9), region = 102 }
 0x28a   : > { %s1423_s26 = smov %s1414_s12 }
 0x290   :  { %590 = vsyncpa [#allocation3], 1 }
 0x291   :  { %592 = vsyncpa [#allocation3 + $0x1], 1 }
 0x292   :  { %593 = vsyncpa [#allocation4], 1 }
 0x293   :  { %595 = vsyncpa [#allocation4 + $0x1], 1 }

</bundles_post_ra>
